<compile_context>
chip_gen: v7x
topology: tpu7x:2x2x1
jax: 0.10.0
libtpu: 0.0.40
codegen_flags: <defaults>
</compile_context>

<pallas_src>
import functools

import jax
import jax.numpy as jnp
from jax.experimental import pallas as pl
from jax.experimental.pallas import tpu as pltpu


_TARGET_BLOCK_BYTES = 1 << 20   # ~1 MiB per input block (2 inputs x 2 buffers = 4 MiB)


def _wce_mil_kernel(pred_ref, tgt_ref, params_ref, out_ref, *,
                    eps, smooth_eps, true_b, group, nb_inner, ragged,
                    use_logits_bce):
    """Grid = (n_split, n_class_tiles, n_batch_tiles); batch axis innermost.

    out_ref is the (1, 1, tc) VMEM-resident running-sum accumulator for the
    current (split, class-tile): zeroed on the first batch step, scaled by
    class_weights / B on the last one.
    params_ref rows: [1 - alpha, 2*alpha - 1, class_weights / B, group_offset].
    """
    s = pl.program_id(0)          # batch-split index (parallel axis)
    i = pl.program_id(2)          # batch-tile index (innermost reduction axis)

    @pl.when(i == 0)
    def _init():
        out_ref[...] = jnp.zeros_like(out_ref)

    x = pred_ref[...].astype(jnp.float32)         # [TB, TC]
    tgt = tgt_ref[...].astype(jnp.float32)        # [TB, TC]
    prm = params_ref[...]                         # [4, TC] f32
    one_m_alpha = prm[0:1, :]                     # 1 - alpha
    alpha_m = prm[1:2, :]                         # 2*alpha - 1
    scale = prm[2:3, :]                           # class_weights / B
    group_off = prm[3:4, :]                       # packed-group offset (f32)

    # smooth_labels(targets, epsilon=0.1)
    t = tgt * (1.0 - smooth_eps) + (smooth_eps * 0.5)

    if use_logits_bce:
        # Stable BCE-with-logits: 2 EUP pushes/elem (exp, log) instead of 4.
        # log(1 + u) with u = exp(-|x|) in (0, 1]: plain log is accurate here.
        bce = jnp.maximum(x, 0.0) - t * x + jnp.log(1.0 + jnp.exp(-jnp.abs(x)))
    else:
        # Bit-faithful to the PyTorch module (sigmoid + log(. + eps)).
        p = jax.nn.sigmoid(x)
        log_p = jnp.log(p + eps)
        log_1mp = jnp.log(1.0 - p + eps)
        bce = -(log_1mp + t * (log_p - log_1mp))

    # alpha_weight = t*alpha + (1-t)*(1-alpha) == (1-alpha) + t*(2*alpha - 1)
    weighted = (one_m_alpha + t * alpha_m) * bce          # [TB, TC]

    tb = weighted.shape[0]
    if ragged:
        # Only the tile containing the ragged tail pays for masking; interior
        # tiles take the clean branch (pl.when -> skipped at runtime).
        row_start = (s * nb_inner + i) * tb               # packed-row offset
        needs_mask = (row_start + tb) * group > true_b

        @pl.when(jnp.logical_not(needs_mask))
        def _accum_clean():
            out_ref[...] += jnp.sum(weighted, axis=0, keepdims=True)[None]

        @pl.when(needs_mask)
        def _accum_masked():
            row = (jax.lax.broadcasted_iota(jnp.int32, (tb, 1), 0)
                   + row_start).astype(jnp.float32)
            orig_row = row * jnp.float32(group) + group_off     # [TB, TC]
            valid = orig_row < jnp.float32(true_b)
            # Select (NOT multiply): the out-of-bounds tail rows are undefined
            # and may be NaN/Inf after exp/log; the select discards them.
            w = jnp.where(valid, weighted, 0.0)
            out_ref[...] += jnp.sum(w, axis=0, keepdims=True)[None]
    else:
        out_ref[...] += jnp.sum(weighted, axis=0, keepdims=True)[None]

    @pl.when(i == nb_inner - 1)
    def _finalize():
        out_ref[...] = out_ref[...] * scale[None]


def _choose_class_tile(c_work):
    """Largest lane-dense tile (<= 512) dividing c_work, else the full dim."""
    if c_work % 128 != 0:
        return c_work                 # only reachable for c_work <= 512
    for tc in (512, 256, 128):
        if c_work % tc == 0:
            return tc
    return c_work


def _reference(prediction, target, alpha, class_weights, eps=1e-6,
               smooth_eps=0.1, use_logits_bce=False):
    """Pure-JAX reference.  use_logits_bce=False mirrors the PyTorch module
    exactly; True matches the kernel's fast path (differs by O(eps))."""
    prediction = jnp.asarray(prediction, jnp.float32)
    target = jnp.asarray(target, jnp.float32)
    if prediction.ndim == 1:
        prediction = prediction[None, :]
    if target.ndim == 1:
        target = target[None, :]
    C = prediction.shape[1]
    t = target * (1.0 - smooth_eps) + smooth_eps / 2.0
    alpha_arr = jnp.broadcast_to(jnp.asarray(alpha, jnp.float32).reshape(-1), (C,))
    if use_logits_bce:
        x = prediction
        bce = jnp.maximum(x, 0.0) - t * x + jnp.log(1.0 + jnp.exp(-jnp.abs(x)))
    else:
        probs = jax.nn.sigmoid(prediction)
        bce = -(t * jnp.log(probs + eps) + (1.0 - t) * jnp.log(1.0 - probs + eps))
    aw = t * alpha_arr[None, :] + (1.0 - t) * (1.0 - alpha_arr[None, :])
    cls = jnp.mean(aw * bce, axis=0)
    if class_weights is not None:
        cls = cls * jnp.asarray(class_weights, jnp.float32).reshape(-1)
    return cls.sum(), cls


def weighted_ce_mil_loss(prediction, target, alpha=0.25, class_weights=None,
                         eps=1e-6, smooth_eps=0.1, batch_tile=None,
                         use_logits_bce=True, use_pallas=None,
                         min_pallas_elements=64 * 1024):
    """JAX wrapper reproducing WeightedCrossEntropyMILLoss.forward.

    prediction, target: [B, C] or [C] (any float dtype; kept narrow on the
      HBM side, upcast to f32 on vregs inside the kernel).
    alpha: scalar or [C].  class_weights: None or [C].
    Returns (total_loss scalar f32, class_losses [C] f32).
    """
    prediction = jnp.asarray(prediction)
    target = jnp.asarray(target)
    if prediction.ndim == 1:
        prediction = prediction[None, :]
    if target.ndim == 1:
        target = target[None, :]
    B, C = prediction.shape

    if use_pallas is None:
        # Below ~one vreg-worth of work the fixed pallas_call overhead
        # dominates; let XLA fuse the tiny case instead.
        use_pallas = (B * C) >= min_pallas_elements
    if not use_pallas:
        return _reference(prediction, target, alpha, class_weights, eps=eps,
                          smooth_eps=smooth_eps, use_logits_bce=use_logits_bce)

    # ---- per-class parameter vectors (fold 1/B, simplify alpha weighting) --
    alpha_vec = jnp.broadcast_to(jnp.asarray(alpha, jnp.float32).reshape(-1), (C,))
    if class_weights is None:
        cw_vec = jnp.ones((C,), jnp.float32)
    else:
        cw_vec = jnp.broadcast_to(
            jnp.asarray(class_weights, jnp.float32).reshape(-1), (C,))
    one_m_alpha = 1.0 - alpha_vec
    alpha_m = 2.0 * alpha_vec - 1.0
    scale_vec = cw_vec * jnp.float32(1.0 / B)

    # ---- lane packing for small C: view [B, C] as [B/G, G*C] ---------------
    group = max(1, min(128 // C, B)) if C < 128 else 1

    if group > 1:
        if B % group:
            # Tiny (< G rows) zero pad so the reshape stays a free metadata
            # op; the padded rows are excluded by the in-kernel mask.
            # TODO(synk): for huge B with B % G != 0 this still copies once; a
            # prefix slice + tiny pure-JAX remainder would avoid that copy.
            pad = group - (B % group)
            prediction = jnp.pad(prediction, ((0, pad), (0, 0)))
            target = jnp.pad(target, ((0, pad), (0, 0)))
        bp = prediction.shape[0] // group
        c_work = group * C
        pred_w = prediction.reshape(bp, c_work)
        tgt_w = target.reshape(bp, c_work)
        tile_c = lambda v: jnp.tile(v, group)
        group_off = jnp.repeat(jnp.arange(group, dtype=jnp.float32), C)
    else:
        bp = B
        c_work = C
        if C % 128 != 0 and C > 512:
            # Harden large ragged C: pad classes to a multiple of 128 so the
            # class tile never becomes a VMEM-busting (tb, C) block.
            c_work = -(-C // 128) * 128
            prediction = jnp.pad(prediction, ((0, 0), (0, c_work - C)))
            target = jnp.pad(target, ((0, 0), (0, c_work - C)))
        pred_w, tgt_w = prediction, target
        tile_c = lambda v: v
        group_off = jnp.zeros((C,), jnp.float32)

    params = jnp.stack([tile_c(one_m_alpha), tile_c(alpha_m),
                        tile_c(scale_vec), group_off], axis=0)   # (4, G*C)
    if params.shape[1] != c_work:
        params = jnp.pad(params, ((0, 0), (0, c_work - params.shape[1])))

    # ---- class tiling (parallel axis) ---------------------------------------
    tc = _choose_class_tile(c_work)
    n_c = c_work // tc

    # ---- batch tiling (innermost reduction axis, double-buffered) ----------
    itemsize = prediction.dtype.itemsize
    if batch_tile is None:
        batch_tile = max(8, _TARGET_BLOCK_BYTES // (tc * itemsize))
    tb = min(bp, max(8, (batch_tile // 8) * 8))   # sublane-aligned if < bp
    n_b = -(-bp // tb)            # ragged tail handled in-kernel (no jnp.pad)

    # ---- optional 2-way batch split so both v7x TensorCores get work -------
    n_split = 2 if (n_c == 1 and n_b >= 2 and n_b % 2 == 0) else 1
    nb_inner = n_b // n_split

    ragged = (B % group != 0) or (bp % tb != 0)

    kernel = functools.partial(
        _wce_mil_kernel, eps=eps, smooth_eps=smooth_eps, true_b=B,
        group=group, nb_inner=nb_inner, ragged=ragged,
        use_logits_bce=use_logits_bce)

    data_spec = pl.BlockSpec((tb, tc), lambda s, j, i: (s * nb_inner + i, j))
    param_spec = pl.BlockSpec((4, tc), lambda s, j, i: (0, j))

    out = pl.pallas_call(
        kernel,
        out_shape=jax.ShapeDtypeStruct((n_split, 1, c_work), jnp.float32),
        grid_spec=pltpu.PrefetchScalarGridSpec(
            num_scalar_prefetch=0,
            grid=(n_split, n_c, nb_inner),
            in_specs=[data_spec, data_spec, param_spec],
            out_specs=pl.BlockSpec((1, 1, tc), lambda s, j, i: (s, 0, j)),
        ),
        compiler_params=pltpu.CompilerParams(
            dimension_semantics=("parallel", "parallel", "arbitrary")),
    )(pred_w, tgt_w, params)

    cls_packed = jnp.sum(out, axis=(0, 1))                 # (c_work,)
    if group > 1:
        cls_losses = cls_packed.reshape(group, C).sum(axis=0)
    else:
        cls_losses = cls_packed[:C]
    total = jnp.sum(cls_losses)   # tiny final cross-class reduce in the wrapper
    return total, cls_losses


if __name__ == "__main__":
    key = jax.random.PRNGKey(0)
    k1, k2, k3, k4, k5, k6, k7, k8 = jax.random.split(key, 8)

    # Case 1: canonical slide-level MIL shape [B=2, C=4] with per-class alpha
    # and class weights.  Exercises the lane-packing path (G=2, packed width 8).
    B, C = 2, 4
    slide_prediction = jax.random.normal(k1, (B, C), dtype=jnp.float32) * 2.0
    slide_label = (jax.random.uniform(k2, (B, C)) > 0.5).astype(jnp.float32)
    alpha = jnp.array([0.25, 0.30, 0.35, 0.40], dtype=jnp.float32)
    class_weights = jnp.array([1.0, 0.5, 2.0, 1.5], dtype=jnp.float32)

    # 1a) torch-exact eps form.
    total, cls_losses = weighted_ce_mil_loss(
        slide_prediction, slide_label, alpha, class_weights,
        use_logits_bce=False, use_pallas=True)
    total = jax.block_until_ready(total)
    cls_losses = jax.block_until_ready(cls_losses)
    ref_total, ref_cls = _reference(slide_prediction, slide_label, alpha,
                                    class_weights, use_logits_bce=False)
    assert jnp.allclose(total, ref_total, atol=1e-5, rtol=1e-5)
    assert jnp.allclose(cls_losses, ref_cls, atol=1e-5, rtol=1e-5)

    # 1b) fast logits-form BCE (default): tight vs the matching reference and
    #     loose vs the torch-exact reference (difference is O(eps)=1e-6).
    total_f, cls_f = weighted_ce_mil_loss(
        slide_prediction, slide_label, alpha, class_weights, use_pallas=True)
    total_f = jax.block_until_ready(total_f)
    cls_f = jax.block_until_ready(cls_f)
    ref_total_f, ref_cls_f = _reference(slide_prediction, slide_label, alpha,
                                        class_weights, use_logits_bce=True)
    assert jnp.allclose(total_f, ref_total_f, atol=1e-5, rtol=1e-5)
    assert jnp.allclose(cls_f, ref_cls_f, atol=1e-5, rtol=1e-5)
    assert jnp.allclose(cls_f, ref_cls, atol=1e-3, rtol=0.0)

    # Case 2: ragged batch (B % G != 0, Bp % tb != 0), scalar alpha, no class
    # weights -> exercises packing pad, OOB tail masking, the 2-way batch
    # split and multi-tile accumulation.
    B2, C2 = 293, 12
    pred2 = jax.random.normal(k3, (B2, C2), dtype=jnp.float32)
    lbl2 = (jax.random.uniform(k4, (B2, C2)) > 0.5).astype(jnp.float32)
    total2, cls2 = weighted_ce_mil_loss(pred2, lbl2, 0.25, None,
                                        batch_tile=16, use_pallas=True)
    total2 = jax.block_until_ready(total2)
    cls2 = jax.block_until_ready(cls2)
    ref_total2, ref_cls2 = _reference(pred2, lbl2, 0.25, None,
                                      use_logits_bce=True)
    assert jnp.allclose(total2, ref_total2, atol=1e-5, rtol=1e-5)
    assert jnp.allclose(cls2, ref_cls2, atol=1e-5, rtol=1e-5)

    # Case 3: wide-C path (no packing, lane-aligned class tile) with an even
    # number of batch tiles -> exercises the n_split=2 parallel axis and the
    # clean (mask-free) accumulation path.
    B3, C3 = 256, 256
    pred3 = jax.random.normal(k5, (B3, C3), dtype=jnp.float32)
    lbl3 = (jax.random.uniform(k6, (B3, C3)) > 0.5).astype(jnp.float32)
    alpha3 = jax.random.uniform(k7, (C3,), minval=0.1, maxval=0.9)
    cw3 = jax.random.uniform(k8, (C3,), minval=0.5, maxval=2.0)
    total3, cls3 = weighted_ce_mil_loss(pred3, lbl3, alpha3, cw3,
                                        batch_tile=64, use_pallas=True)
    total3 = jax.block_until_ready(total3)
    cls3 = jax.block_until_ready(cls3)
    ref_total3, ref_cls3 = _reference(pred3, lbl3, alpha3, cw3,
                                      use_logits_bce=True)
    assert jnp.allclose(total3, ref_total3, atol=2e-5, rtol=2e-5)
    assert jnp.allclose(cls3, ref_cls3, atol=2e-5, rtol=2e-5)

    print("KERNEL_OK")
</pallas_src>

<mosaic_0001>
module attributes {stable_mosaic.version = 11 : i64} {
  func.func @_wce_mil_kernel(%arg0: i32, %arg1: i32, %arg2: i32, %arg3: memref<1x8xf32, #tpu.memory_space<vmem>>, %arg4: memref<1x8xf32, #tpu.memory_space<vmem>>, %arg5: memref<4x8xf32, #tpu.memory_space<vmem>>, %arg6: memref<1x1x8xf32, #tpu.memory_space<vmem>>) attributes {dimension_semantics = [#tpu.dimension_semantics<parallel>, #tpu.dimension_semantics<parallel>, #tpu.dimension_semantics<arbitrary>], iteration_bounds = array<i64: 1, 1, 1>, scalar_prefetch = 0 : i64, scratch_operands = 0 : i64, tpu.core_type = #tpu.core_type<tc>, window_params = [{transform_indices = @transform_0, window_bounds = array<i64: 1, 8>}, {transform_indices = @transform_1, window_bounds = array<i64: 1, 8>}, {transform_indices = @transform_2, window_bounds = array<i64: 4, 8>}, {transform_indices = @transform_3, window_bounds = array<i64: 1, 1, 8>}]} {
    %c0_i32 = arith.constant 0 : i32
    %0 = arith.cmpi eq, %arg2, %c0_i32 : i32
    %1 = arith.extui %0 : i1 to i32
    %c0_i32_0 = arith.constant 0 : i32
    %2 = arith.cmpi ne, %1, %c0_i32_0 : i32
    scf.if %2 {
      %cst_21 = arith.constant 0.000000e+00 : f32
      %43 = vector.broadcast %cst_21 : f32 to vector<1x1x8xf32>
      %c0_22 = arith.constant 0 : index
      %c0_23 = arith.constant 0 : index
      %c0_24 = arith.constant 0 : index
      %44 = vector.load %arg6[%c0_22, %c0_23, %c0_24] : memref<1x1x8xf32, #tpu.memory_space<vmem>>, vector<1x1x8xf32>
      tpu.vector_store %arg6[%c0_22, %c0_23, %c0_24], %43 {strides = array<i32>} : memref<1x1x8xf32, #tpu.memory_space<vmem>>, vector<1x1x8xf32>,
    } else {
    }
    %c0 = arith.constant 0 : index
    %c0_1 = arith.constant 0 : index
    %3 = vector.load %arg3[%c0, %c0_1] : memref<1x8xf32, #tpu.memory_space<vmem>>, vector<1x8xf32>
    %c0_2 = arith.constant 0 : index
    %c0_3 = arith.constant 0 : index
    %4 = vector.load %arg4[%c0_2, %c0_3] : memref<1x8xf32, #tpu.memory_space<vmem>>, vector<1x8xf32>
    %c0_4 = arith.constant 0 : index
    %c0_5 = arith.constant 0 : index
    %5 = vector.load %arg5[%c0_4, %c0_5] : memref<4x8xf32, #tpu.memory_space<vmem>>, vector<4x8xf32>
    %6 = vector.extract_strided_slice %5 {offsets = [0, 0], sizes = [1, 8], strides = [1, 1]} : vector<4x8xf32> to vector<1x8xf32>
    %7 = vector.extract_strided_slice %5 {offsets = [1, 0], sizes = [1, 8], strides = [1, 1]} : vector<4x8xf32> to vector<1x8xf32>
    %8 = vector.extract_strided_slice %5 {offsets = [2, 0], sizes = [1, 8], strides = [1, 1]} : vector<4x8xf32> to vector<1x8xf32>
    %cst = arith.constant 0.899999976 : f32
    %9 = vector.broadcast %cst : f32 to vector<1x8xf32>
    %10 = arith.mulf %4, %9 : vector<1x8xf32>
    %cst_6 = arith.constant 5.000000e-02 : f32
    %11 = vector.broadcast %cst_6 : f32 to vector<1x8xf32>
    %12 = arith.addf %10, %11 : vector<1x8xf32>
    %13 = arith.negf %3 : vector<1x8xf32>
    %14 = math.exp %13 : vector<1x8xf32>
    %cst_7 = arith.constant 1.000000e+00 : f32
    %15 = vector.broadcast %cst_7 : f32 to vector<1x8xf32>
    %16 = arith.addf %15, %14 : vector<1x8xf32>
    %17 = arith.divf %15, %16 : vector<1x8xf32>
    %cst_8 = arith.constant 9.99999997E-7 : f32
    %18 = vector.broadcast %cst_8 : f32 to vector<1x8xf32>
    %19 = arith.addf %17, %18 : vector<1x8xf32>
    %20 = math.log %19 : vector<1x8xf32>
    %cst_9 = arith.constant 1.000000e+00 : f32
    %21 = vector.broadcast %cst_9 : f32 to vector<1x8xf32>
    %22 = arith.subf %21, %17 : vector<1x8xf32>
    %cst_10 = arith.constant 9.99999997E-7 : f32
    %23 = vector.broadcast %cst_10 : f32 to vector<1x8xf32>
    %24 = arith.addf %22, %23 : vector<1x8xf32>
    %25 = math.log %24 : vector<1x8xf32>
    %26 = arith.subf %20, %25 : vector<1x8xf32>
    %27 = arith.mulf %12, %26 : vector<1x8xf32>
    %28 = arith.addf %25, %27 : vector<1x8xf32>
    %cst_11 = arith.constant 0.000000e+00 : f32
    %29 = vector.broadcast %cst_11 : f32 to vector<1x8xf32>
    %30 = arith.subf %29, %28 : vector<1x8xf32>
    %31 = arith.mulf %12, %7 : vector<1x8xf32>
    %32 = arith.addf %6, %31 : vector<1x8xf32>
    %33 = arith.mulf %32, %30 : vector<1x8xf32>
    %c0_12 = arith.constant 0 : index
    %c0_13 = arith.constant 0 : index
    %c0_14 = arith.constant 0 : index
    %34 = vector.load %arg6[%c0_12, %c0_13, %c0_14] : memref<1x1x8xf32, #tpu.memory_space<vmem>>, vector<1x1x8xf32>
    %cst_15 = arith.constant dense<0.000000e+00> : vector<8xf32>
    %35 = vector.multi_reduction <add>, %33, %cst_15 [0] : vector<1x8xf32> to vector<8xf32>
    %36 = vector.shape_cast %35 : vector<8xf32> to vector<1x8xf32>
    %37 = vector.shape_cast %36 : vector<1x8xf32> to vector<1x1x8xf32>
    %38 = arith.addf %34, %37 : vector<1x1x8xf32>
    %c0_16 = arith.constant 0 : index
    %c0_17 = arith.constant 0 : index
    %c0_18 = arith.constant 0 : index
    %39 = vector.load %arg6[%c0_16, %c0_17, %c0_18] : memref<1x1x8xf32, #tpu.memory_space<vmem>>, vector<1x1x8xf32>
    tpu.vector_store %arg6[%c0_16, %c0_17, %c0_18], %38 {strides = array<i32>} : memref<1x1x8xf32, #tpu.memory_space<vmem>>, vector<1x1x8xf32>,
    %c0_i32_19 = arith.constant 0 : i32
    %40 = arith.cmpi eq, %arg2, %c0_i32_19 : i32
    %41 = arith.extui %40 : i1 to i32
    %c0_i32_20 = arith.constant 0 : i32
    %42 = arith.cmpi ne, %41, %c0_i32_20 : i32
    scf.if %42 {
      %c0_21 = arith.constant 0 : index
      %c0_22 = arith.constant 0 : index
      %c0_23 = arith.constant 0 : index
      %43 = vector.load %arg6[%c0_21, %c0_22, %c0_23] : memref<1x1x8xf32, #tpu.memory_space<vmem>>, vector<1x1x8xf32>
      %44 = vector.shape_cast %8 : vector<1x8xf32> to vector<1x1x8xf32>
      %45 = arith.mulf %43, %44 : vector<1x1x8xf32>
      %c0_24 = arith.constant 0 : index
      %c0_25 = arith.constant 0 : index
      %c0_26 = arith.constant 0 : index
      %46 = vector.load %arg6[%c0_24, %c0_25, %c0_26] : memref<1x1x8xf32, #tpu.memory_space<vmem>>, vector<1x1x8xf32>
      tpu.vector_store %arg6[%c0_24, %c0_25, %c0_26], %45 {strides = array<i32>} : memref<1x1x8xf32, #tpu.memory_space<vmem>>, vector<1x1x8xf32>,
    } else {
    }
    return
  }
  func.func @transform_0(%arg0: i32, %arg1: i32, %arg2: i32) -> (i32, i32) {
    %c1_i32 = arith.constant 1 : i32
    %0 = arith.muli %arg0, %c1_i32 : i32
    %1 = arith.addi %0, %arg2 : i32
    %c0_i32 = arith.constant 0 : i32
    return %1, %arg1 : i32, i32
  }
  func.func @transform_1(%arg0: i32, %arg1: i32, %arg2: i32) -> (i32, i32) {
    %c1_i32 = arith.constant 1 : i32
    %0 = arith.muli %arg0, %c1_i32 : i32
    %1 = arith.addi %0, %arg2 : i32
    %c0_i32 = arith.constant 0 : i32
    return %1, %arg1 : i32, i32
  }
  func.func @transform_2(%arg0: i32, %arg1: i32, %arg2: i32) -> (i32, i32) {
    %c0_i32 = arith.constant 0 : i32
    %c0_i32_0 = arith.constant 0 : i32
    return %c0_i32, %arg1 : i32, i32
  }
  func.func @transform_3(%arg0: i32, %arg1: i32, %arg2: i32) -> (i32, i32, i32) {
    %c0_i32 = arith.constant 0 : i32
    %c0_i32_0 = arith.constant 0 : i32
    return %arg0, %c0_i32, %arg1 : i32, i32, i32
  }
}

</mosaic_0001>

<bundles_post_ra>
// kernel: tpu_custom_call.1
= control target key start
LH: loop header
LB: loop body
LE: loop exit
PB: predicated region body
PF: predicated region fallthrough
CT: control target
= control target key end

     0   :  { %8 = vsyncpa [#allocation3], 0  ;;  %s249_s0 = inlined_call_operand.hbm [shape: f32[1,8], index: 0, kind: input, shape index: {}]   ;;  %s250_s1 = inlined_call_operand.vmem [shape: f32[1,8], index: 1, kind: input, shape index: {}]   ;;  %s251_s2 = inlined_call_operand.vmem [shape: f32[4,8], index: 2, kind: input, shape index: {}]   ;;  %s252_s3 = inlined_call_operand.hbm [shape: f32[1,1,8], index: 3, kind: output, shape index: {}]  }
   0x1   :  { %9 = vsyncpa [#allocation4], 0  ;;  %s192_s12 = smov [#allocation2]   ;;  %s144_s16 = scalar_lea.hbm %s249_s0, 16 }
   0x2   :  { %s19_s13 = sshll.u32 %s192_s12, 4  ;;  %p145_p0 = scmp.ne.s32.totalorder %s249_s0, %s144_s16  ;;  %s20_s13 = int_to_ptr.vmem [resolvable:$true] %s19_s13 }
   0x3   :  { %p148_p1 = scmp.lt.u32.totalorder %s144_s16, %s249_s0 }
   0x5   :  { %p150_p2 = pnand %p148_p1, %p145_p0 }
   0x7   :  { %153 = shalt.err (!%p150_p2)
}
   0x8   :  { %s154_s21 = scalar_lea.vmem %s20_s13, 16  ;;  %s158_s22 = scalar_lea.vmem %s20_s13, 32 }
   0x9   :  { %p155_p3 = scmp.ne.s32.totalorder %s20_s13, %s154_s21  ;;  %p159_p4 = scmp.lt.s32.totalorder %s20_s13, %s20_s13 }
   0xa   :  { %p160_p5 = scmp.lt.s32.totalorder %s158_s22, %s154_s21 }
   0xc   :  { %p161_p6 = por %p160_p5, %p159_p4 }
   0xe   :  { %p162_p7 = pnand %p161_p6, %p155_p3 }
  0x10   :  { %165 = shalt.err (!%p162_p7)
}
  0x11   :  { %22 = dma.hbm_to_vmem [thread:$0]  %s249_s0, 16, %s20_s13, [#allocation3]  }
  0x12   :  { %188 = dma.done.wait [#allocation3], 16  }
  0x13   :  { %189 = vsyncadd [#allocation3], 4294967280  ;;  %vm49_vm0 = vcmask 57344   ;;  %v193_v0 = vmov 0.0   ;;  %v51_v1 = vld [vmem:[#allocation2] sm:$0x1]  ;;  %v77_v7 = vlaneseq }
  0x14   :  { %50 = vst.msk [vmem:[#allocation5] sm:$0x1] %vm49_vm0, %v193_v0  ;;  %v131_v2 = vmul.f32 -1.442695, %v51_v1  ;;  %v194_v5 = vmov 1966171168  }
  0x15   :  { %v75_v6 = vunpack.c.l.s4 %v194_v5  ;;  %v78_v9 = vshrl.u32 %v77_v7, 7  ;;  %v53_v14 = vld [vmem:[%s251_s2] sm:$0xf] }
  0x16   :  { %136 = vpow2.f32 %v131_v2  ;;  %v52_v17 = vld [vmem:[%s250_s1] sm:$0x1]  ;;  %s195_s1 = smov [#allocation5]  }
  0x17   :  { %v76_v8 = vunpack.c.0.s8 %v75_v6  ;;  %v54_v19 = vmul.f32 0.9, %v52_v17  ;;  %s119_s2 = sshll.u32 %s195_s1, 4  ;;  %s120_s2 = int_to_ptr.vmem [resolvable:$true] %s119_s2 }
  0x18   :  { %s166_s28 = scalar_lea.vmem %s120_s2, 16  ;;  %s170_s29 = scalar_lea.vmem %s120_s2, 32 }
  0x19   :  { %v79_v13 = vsub.s32 %v76_v8, %v78_v9  ;;  %v55_v24 = vadd.f32 0.05, %v54_v19  ;;  %p167_p8 = scmp.ne.s32.totalorder %s120_s2, %s166_s28  ;;  %p171_p9 = scmp.lt.s32.totalorder %s120_s2, %s120_s2 }
  0x1a   :  { %p172_p10 = scmp.lt.s32.totalorder %s170_s29, %s166_s28 }
  0x1b   :  { %v80_v16 = vrot.slane %v53_v14, %v79_v13  ;;  %v100_v32 = vld [vmem:[#allocation5] sm:$0x1] }
  0x1c   :  { %p173_p11 = por %p172_p10, %p171_p9 }
  0x1d   :  { %v81_v18 = vcombine.high %v80_v16, %v80_v16  ;;  %v88_v35 = vrot.slane %v80_v16, %v79_v13 }
  0x1e   :  { %p174_p12 = pnand %p173_p11, %p167_p8 }
  0x1f   :  { %v95_v22 = vrot.slane %v81_v18, %v79_v13  ;;  %v109_v36 = vcombine.high %v88_v35, %v88_v35 }
  0x20   :  { %v137_v3 = vpop.eup %136 }
  0x21   :  { %v59_v4 = vadd.f32 1.0, %v137_v3  ;;  %v97_v27 = vmul.f32 %v95_v22, %v55_v24 }
  0x23   :  { %138 = vrcp.f32 %v59_v4  ;;  %v98_v30 = vadd.f32 %v97_v27, %v53_v14 }
  0x2d   :  { %v139_v10 = vpop.eup %138 }
  0x2e   :  { %v62_v11 = vadd.f32 1e-06, %v139_v10  ;;  %v65_v12 = vsub.f32 1.0, %v139_v10 }
  0x30   :  { %140 = vlog2.f32 %v62_v11  ;;  %v66_v15 = vadd.f32 1e-06, %v65_v12 }
  0x32   :  { %142 = vlog2.f32 %v66_v15 }
  0x3a   :  { %v141_v20 = vpop.eup %140 }
  0x3b   :  { %v64_v21 = vmul.f32 0.6931472, %v141_v20 }
  0x3c   :  { %v143_v23 = vpop.eup %142 }
  0x3d   :  { %v68_v25 = vmul.f32 0.6931472, %v143_v23 }
  0x3f   :  { %v69_v26 = vsub.f32 %v64_v21, %v68_v25 }
  0x41   :  { %v70_v28 = vmul.f32 %v69_v26, %v55_v24 }
  0x43   :  { %v71_v29 = vadd.f32 %v70_v28, %v68_v25 }
  0x45   :  { %v72_v31 = vsub.f32 0.0, %v71_v29 }
  0x47   :  { %v99_v33 = vmul.f32 %v98_v30, %v72_v31 }
  0x49   :  { %v102_v34 = vadd.f32 %v100_v32, %v99_v33 }
  0x4b   :  { %104 = vst.msk [vmem:[#allocation5] sm:$0x1] %vm49_vm0, %v102_v34 }
  0x52   :  { %v108_v37 = vld [vmem:[#allocation5] sm:$0x1] }
  0x53   :  { %v111_v38 = vmul.f32 %v109_v36, %v108_v37 }
  0x55   :  { %112 = vst.msk [vmem:[#allocation5] sm:$0x1] %vm49_vm0, %v111_v38 }
  0x56   :  { %177 = shalt.err (!%p174_p12)
}
  0x57   :  { %s178_s5 = scalar_lea.hbm %s252_s3, 16 }
  0x58   :  { %p179_p13 = scmp.ne.s32.totalorder %s252_s3, %s178_s5  ;;  %p182_p0 = scmp.lt.u32.totalorder %s178_s5, %s252_s3 }
  0x5a   :  { %p184_p1 = pnand %p182_p0, %p179_p13 }
  0x5c   :  { %187 = shalt.err (!%p184_p1)
}
  0x5d   :  { %122 = dma.vmem_to_hbm [thread:$0]  %s120_s2, 16, %s252_s3, [#allocation4]  }
  0x5e   :  { %190 = dma.done.wait [#allocation4], 16  }
  0x5f   :  { %191 = vsyncadd [#allocation4], 4294967280 }
  0x60   :  { %126 = vsyncpa [#allocation3], 1 }
  0x61   :  { %127 = vsyncpa [#allocation4], 1 }

</bundles_post_ra>
